<compile_context>
chip_gen: v5e
topology: v5e:2x2
jax: 0.10.0
libtpu: 0.0.40
codegen_flags: <defaults>
</compile_context>

<pallas_src>
import functools
import random

import jax
import jax.numpy as jnp
from jax import lax
from jax.experimental import pallas as pl
from jax.experimental.pallas import tpu as pltpu

_ROW_BUCKET = 128  # bucket sl to this many rows to avoid per-sl Mosaic recompiles


def _pos_emb_dma_kernel(start_ref, emb_hbm, out_hbm, sem):
    """Copy `rows` contiguous table rows HBM->HBM with a single DMA.

    start_ref: SMEM scalar-prefetch ref, shape (1,), int32 -- first row of the window.
    emb_hbm:   full embedding table, left in HBM (memory_space=pl.ANY).
    out_hbm:   output buffer, also left in HBM (memory_space=pl.ANY).
    sem:       DMA completion semaphore.
    """
    rows = out_hbm.shape[0]
    cp = pltpu.make_async_copy(
        emb_hbm.at[pl.ds(start_ref[0], rows), :], out_hbm, sem)
    cp.start()
    cp.wait()


@functools.lru_cache(maxsize=None)
def _build_window_copy(seq_len: int, model_dim: int, rows: int, dtype_name: str):
    """Build (and cache) a jitted pallas_call that copies `rows` table rows starting
    at a dynamic row index out of a (seq_len, model_dim) table kept in HBM."""
    dtype = jnp.dtype(dtype_name)
    grid_spec = pltpu.PrefetchScalarGridSpec(
        num_scalar_prefetch=1,                         # start index lands in SMEM
        grid=(1,),                                     # single DMA, no pipeline loop
        in_specs=[pl.BlockSpec(memory_space=pl.ANY)],  # table stays in HBM
        out_specs=pl.BlockSpec(memory_space=pl.ANY),   # output written by DMA, no VMEM hop
        scratch_shapes=[pltpu.SemaphoreType.DMA(())],
    )
    kernel = pl.pallas_call(
        _pos_emb_dma_kernel,
        grid_spec=grid_spec,
        out_shape=jax.ShapeDtypeStruct((rows, model_dim), dtype),
    )
    return jax.jit(kernel)


@functools.partial(jax.jit, static_argnames=("rows",))
def _take_rows(arr, offset, *, rows):
    # Dynamic offset, static length -> no recompile when the window start changes.
    return lax.dynamic_slice(arr, (offset, jnp.int32(0)), (rows, arr.shape[1]))


def _round_up(x: int, m: int) -> int:
    return ((x + m - 1) // m) * m


class LearnedPositionEmbeddings:
    """JAX/Pallas re-implementation of the PyTorch module."""

    def __init__(self, seq_len, model_dim, init=0.02, relative=False, key=None,
                 dtype=jnp.float32):
        if key is None:
            key = jax.random.PRNGKey(0)
        # torch.nn.Embedding(seq_len, model_dim) weight, init N(0, init)
        self.weight = (init * jax.random.normal(key, (seq_len, model_dim))).astype(dtype)
        self.seq_len = seq_len
        self.model_dim = model_dim
        self.relative = relative

    def _window(self, start: int, sl: int):
        seq_len = self.seq_len
        # pl.ds on an HBM ref has no runtime bounds check -> enforce on the host.
        assert 0 < sl <= seq_len and 0 <= start and start + sl <= seq_len, \
            "position window out of range"

        # Bucket the copy length so varying sl reuses one compiled kernel.
        rows = min(seq_len, _round_up(sl, _ROW_BUCKET))

        # Place the bucketed window inside the table and sublane-align its start
        # when the slack allows (avoids the slow shifted-DMA source path).
        start_dma = min(start, seq_len - rows)
        aligned = (start_dma // 8) * 8
        if start + sl <= aligned + rows:
            start_dma = aligned
        offset = start - start_dma  # host-side int, >= 0, offset + sl <= rows

        fn = _build_window_copy(seq_len, self.model_dim, rows, str(self.weight.dtype))
        win = fn(jnp.asarray([start_dma], dtype=jnp.int32), self.weight)
        if offset == 0 and rows == sl:
            return win
        return _take_rows(win, jnp.int32(offset), rows=sl)

    def __call__(self, x):
        sl = x.shape[1]
        if self.relative:
            # TODO(synk): host-side random.randint kept for parity with the PyTorch
            # module; switch to jax.random.randint if this must fuse into a jitted graph.
            start = random.randint(sl, self.seq_len) - sl
        else:
            start = 0
        return self._window(start, sl)

    def get_fixed_embedding(self, ind):
        # emb(torch.tensor([ind])).unsqueeze(0) -> shape (1, 1, model_dim).
        # Single-row lookup: a kernel launch here is pure dispatch overhead, use a slice.
        return self.weight[ind][None, None, :]


if __name__ == "__main__":
    key = jax.random.PRNGKey(0)
    k_w, k_w2, k_x = jax.random.split(key, 3)

    # ---- absolute (relative=False) path ------------------------------------
    seq_len, model_dim = 32, 32
    batch, sl = 2, 8
    mod = LearnedPositionEmbeddings(seq_len, model_dim, init=0.02, relative=False, key=k_w)

    # x: token ids (only x.shape[1] is used by the forward pass)
    x = jax.random.randint(k_x, (batch, sl), 0, 100, dtype=jnp.int32)

    out = mod(x)
    jax.block_until_ready(out)
    assert out.shape == (sl, model_dim)
    assert jnp.allclose(out, mod.weight[:sl]), "mismatch vs reference embedding lookup"

    # second call with the same sl hits the cached jitted kernel (no recompile)
    out2 = mod(x)
    jax.block_until_ready(out2)
    assert jnp.allclose(out2, mod.weight[:sl])

    # ---- relative=True path (dynamic non-zero start, window smaller than table)
    seq_len2 = 384
    mod_rel = LearnedPositionEmbeddings(seq_len2, model_dim, init=0.02, relative=True,
                                        key=k_w2)
    random.seed(0)
    out_rel = mod_rel(x)
    jax.block_until_ready(out_rel)
    random.seed(0)
    start_chk = random.randint(sl, seq_len2) - sl
    assert out_rel.shape == (sl, model_dim)
    assert jnp.allclose(out_rel, mod_rel.weight[start_chk:start_chk + sl])

    # ---- get_fixed_embedding -------------------------------------------------
    fixed = mod.get_fixed_embedding(3)
    jax.block_until_ready(fixed)
    assert fixed.shape == (1, 1, model_dim)
    assert jnp.allclose(fixed[0, 0], mod.weight[3])

    print("KERNEL_OK")
</pallas_src>

<mosaic_0001>
module attributes {stable_mosaic.version = 11 : i64} {
  func.func @_pos_emb_dma_kernel(%arg0: i32, %arg1: memref<1xi32, #tpu.memory_space<smem>>, %arg2: memref<32x32xf32, #tpu.memory_space<any>>, %arg3: memref<32x32xf32, #tpu.memory_space<any>>, %arg4: memref<!tpu.dma_semaphore, #tpu.memory_space<semaphore_mem>>) attributes {dimension_semantics = [#tpu.dimension_semantics<arbitrary>], iteration_bounds = array<i64: 1>, scalar_prefetch = 1 : i64, scratch_operands = 1 : i64, tpu.core_type = #tpu.core_type<tc>, window_params = [{}, {}]} {
    %c0 = arith.constant 0 : index
    %0 = memref.load %arg1[%c0] : memref<1xi32, #tpu.memory_space<smem>>
    %c0_i32 = arith.constant 0 : i32
    %1 = tpu.memref_slice %arg2[%0, %c0_i32] : memref<32x32xf32, #tpu.memory_space<any>> -> memref<32x32xf32, #tpu.memory_space<any>>
    tpu.enqueue_dma source(%1 : memref<32x32xf32, #tpu.memory_space<any>>) target(%arg3 : memref<32x32xf32, #tpu.memory_space<any>>) target_semaphore(%arg4 : memref<!tpu.dma_semaphore, #tpu.memory_space<semaphore_mem>>)
    %c0_i32_0 = arith.constant 0 : i32
    %2 = tpu.memref_slice %arg2[%0, %c0_i32_0] : memref<32x32xf32, #tpu.memory_space<any>> -> memref<32x32xf32, #tpu.memory_space<any>>
    tpu.wait_dma2 semaphore(%arg4 : memref<!tpu.dma_semaphore, #tpu.memory_space<semaphore_mem>>) src(%2 : memref<32x32xf32, #tpu.memory_space<any>>) dst(%arg3 : memref<32x32xf32, #tpu.memory_space<any>>)
    return
  }
}

</mosaic_0001>

<bundles_post_ra>
// kernel: tpu_custom_call.1
= control target key start
LH: loop header
LB: loop body
LE: loop exit
PB: predicated region body
PF: predicated region fallthrough
CT: control target
= control target key end

     0   :  { %s37_s18 = smov [#allocation2]   ;;  %s38_s19 = smov [#allocation5]   ;;  %s64_s0 = inlined_call_operand.<no memory space> [shape: s32[1], index: 0, kind: input, shape index: {}]   ;;  %s65_s1 = inlined_call_operand.hbm [shape: f32[32,32], index: 1, kind: input, shape index: {}]   ;;  %s66_s2 = inlined_call_operand.hbm [shape: f32[32,32], index: 2, kind: output, shape index: {}]  }
   0x1   :  { %s9_s13 = scalar_lea.hbm %s65_s1, %s64_s0  ;;  %s16_s16 = sshll.u32 %s66_s2, 4  ;;  %s17_s16 = int_to_ptr.hbm [resolvable:$true] %s16_s16 }
   0x2   :  { %s14_s17 = sshll.u32 %s9_s13, 4  ;;  %s39_s20 = smov 0   ;;  %s15_s17 = int_to_ptr.hbm [resolvable:$true] %s14_s17 }
   0x3   :  { %20 = dma.general %s15_s17, 512, %s17_s16, %s37_s18, %s38_s19, [#allocation6], %s39_s20, 0  }
   0x4   :  { %35 = dma.done.wait [#allocation2], 512 }
   0x5   :  { %36 = vsyncadd [#allocation2], 4294966784 }
   0x6   :  { %24 = vsyncmov [#allocation2] }
   0x9   :  { %s25_s21 = vpop.sfrf %24 }
   0xa   :  { %p31_p0 = scmp.ne.s32.totalorder %s25_s21, 0 }
   0xc   :  { %29 = shalt.err (%p31_p0)  }

</bundles_post_ra>
